<compile_context>
chip_gen: v5e
topology: v5e:2x2
jax: 0.10.0
libtpu: 0.0.40
codegen_flags: <defaults>
</compile_context>

<pallas_src>
import math
from functools import partial

import jax
import jax.numpy as jnp
from jax.experimental import pallas as pl
from jax.experimental.pallas import tpu as pltpu

_LANES = 128
_CLIP_MIN = 1e-07
_CLIP_MAX = 1.0 - 0.001


def _isup_cce_loss_kernel(y_pred_ref, y_true_ref, out_ref, acc_ref, *,
                          n_valid, inner_tiles, tile_rows, has_tail):
    p = pl.program_id(0)   # parallel split (megacore on multi-TC chips)
    i = pl.program_id(1)   # reduction over tiles (arbitrary)

    @pl.when(i == 0)
    def _init():
        acc_ref[...] = jnp.zeros_like(acc_ref)

    y_pred = y_pred_ref[...].astype(jnp.float32)     # upcast in-kernel
    y_true = y_true_ref[...]

    # where(y_true == 1, p, 1 - p); exact-1 test matches the PyTorch reference.
    result = jnp.where(y_true == 1, y_pred, 1.0 - y_pred)
    clipped = jnp.clip(result, _CLIP_MIN, _CLIP_MAX)

    def fold8(x):
        # (tile_rows, 128) -> (8, 128) via leading-axis (vreg-wise) adds.
        return x.reshape(tile_rows // 8, 8, _LANES).sum(axis=0)

    tile_elems = tile_rows * _LANES

    if has_tail:
        gt = p * inner_tiles + i                      # global tile index
        needs_mask = (gt + 1) * tile_elems > n_valid  # scalar; boundary/overflow

        @pl.when(jnp.logical_not(needs_mask))
        def _full():
            # Steady state: no masking work at all.
            acc_ref[...] += fold8(jnp.log(clipped))

        @pl.when(needs_mask)
        def _tail():
            # Intra-tile index vs. remaining-valid count (no global flat index
            # -> no int32 wraparound risk); limit <= 0 for fully-masked tiles.
            row = jax.lax.broadcasted_iota(jnp.int32, (tile_rows, _LANES), 0)
            lane = jax.lax.broadcasted_iota(jnp.int32, (tile_rows, _LANES), 1)
            intra = row * _LANES + lane
            limit = n_valid - gt * tile_elems
            valid = intra < limit
            safe = jnp.where(valid, clipped, 1.0)     # log(1) == 0 for pad/OOB
            acc_ref[...] += fold8(jnp.log(safe))
    else:
        acc_ref[...] += fold8(jnp.log(clipped))

    @pl.when(i == pl.num_programs(1) - 1)
    def _finalize():
        # Lane-dense unmasked (8, 128) store of this core's partial (+log sum).
        out_ref[...] = acc_ref[...]


def _default_num_splits():
    # 2-way grid split only pays off on multi-TensorCore chips (v7x).
    try:
        kind = jax.devices()[0].device_kind.lower()
    except Exception:
        return 1
    return 2 if "v7" in kind else 1


def isup_cce_loss(y_pred: jax.Array, y_true: jax.Array, *,
                  tile_rows: int = 8192, num_splits: int | None = None
                  ) -> jax.Array:
    """Scalar ISUP CCE loss.  y_pred / y_true: same shape, any rank >= 1.

    For minimum HBM traffic pass y_pred as bf16 and y_true as bool/int8;
    the kernel upcasts / compares in-kernel (no wrapper-side casts are added).
    """
    assert y_pred.shape == y_true.shape
    n_valid = math.prod(y_pred.shape)
    assert 0 < n_valid < 2**31

    rows_needed = pl.cdiv(n_valid, _LANES)
    pad_elems = rows_needed * _LANES - n_valid        # < 128; usually 0

    # Tile rows: multiple of 8, no larger than needed.
    tile_rows = max(8, ((tile_rows + 7) // 8) * 8)
    tile_rows = min(tile_rows, ((rows_needed + 7) // 8) * 8)
    num_tiles = pl.cdiv(rows_needed, tile_rows)

    if num_splits is None:
        num_splits = _default_num_splits()
    if num_tiles < num_splits:
        num_splits = 1
    inner_tiles = pl.cdiv(num_tiles, num_splits)

    total_grid_elems = num_splits * inner_tiles * tile_rows * _LANES
    assert total_grid_elems < 2**31                   # int32-safe tile offsets
    has_tail = total_grid_elems > n_valid

    def to_slab(x):
        flat = x.reshape(-1)                          # free (contiguous)
        if pad_elems:
            # Minimal pad to a whole 128-lane row; value irrelevant (masked).
            flat = jnp.pad(flat, (0, pad_elems), constant_values=1)
        return flat.reshape(rows_needed, _LANES)

    kernel = partial(_isup_cce_loss_kernel, n_valid=n_valid,
                     inner_tiles=inner_tiles, tile_rows=tile_rows,
                     has_tail=has_tail)

    # Clamp overflow tiles (from cdiv rounding) onto the last real tile; their
    # contribution is fully masked in-kernel, so re-reading it is harmless and
    # no fully-out-of-bounds block index is ever produced.
    last_tile = num_tiles - 1
    in_map = lambda p, i: (jnp.minimum(p * inner_tiles + i, last_tile), 0)

    # Explicit VMEM budget: 2 inputs x 2 pipeline buffers x tile + headroom
    # (v5e's default scoped VMEM is only 16 MiB; v7x physical is 64 MiB).
    in_bytes = 2 * tile_rows * _LANES * (
        jnp.dtype(y_pred.dtype).itemsize + jnp.dtype(y_true.dtype).itemsize)
    vmem_limit = int(min(max(in_bytes + (4 << 20), 16 << 20), 48 << 20))

    partials = pl.pallas_call(
        kernel,
        out_shape=jax.ShapeDtypeStruct((num_splits * 8, _LANES), jnp.float32),
        grid_spec=pltpu.PrefetchScalarGridSpec(
            num_scalar_prefetch=0,
            grid=(num_splits, inner_tiles),
            in_specs=[
                pl.BlockSpec((tile_rows, _LANES), in_map),
                pl.BlockSpec((tile_rows, _LANES), in_map),
            ],
            out_specs=pl.BlockSpec((8, _LANES), lambda p, i: (p, 0)),
            scratch_shapes=[pltpu.VMEM((8, _LANES), jnp.float32)],
        ),
        compiler_params=pltpu.CompilerParams(
            dimension_semantics=("parallel", "arbitrary"),
            vmem_limit_bytes=vmem_limit,
        ),
    )(to_slab(y_pred), to_slab(y_true))

    # Tiny (num_splits*8, 128) combine + the single negation in XLA.
    return -jnp.sum(partials)


def _isup_cce_loss_ref(y_pred, y_true):
    result = jnp.where(y_true == 1.0, y_pred, 1.0 - y_pred)
    clipped = jnp.clip(result, _CLIP_MIN, _CLIP_MAX)
    return jnp.sum(-jnp.sum(jnp.log(clipped), axis=1))


if __name__ == "__main__":
    key = jax.random.PRNGKey(0)
    k1, k2, k3, k4 = jax.random.split(key, 4)

    # Small case consistent with the module (e.g. 6 ISUP grade classes).
    B, C = 8, 6
    y_pred = jax.nn.sigmoid(jax.random.normal(k1, (B, C), dtype=jnp.float32))
    y_true = (jax.random.uniform(k2, (B, C)) > 0.5).astype(jnp.float32)

    loss = jax.block_until_ready(isup_cce_loss(y_pred, y_true))
    ref = _isup_cce_loss_ref(y_pred, y_true)
    assert jnp.allclose(loss, ref, rtol=1e-5, atol=1e-5), (loss, ref)

    # Larger case: multi-tile grid with a forced 2-way split, exercising the
    # partial tail tile, the clamped overflow tile, and the no-pad path
    # (1024*300 is a multiple of 128, so no wrapper-side padding fires).
    B2, C2 = 1024, 300
    y_pred2 = jax.nn.sigmoid(jax.random.normal(k3, (B2, C2), dtype=jnp.float32))
    y_true2 = (jax.random.uniform(k4, (B2, C2)) > 0.5).astype(jnp.float32)
    loss2 = jax.block_until_ready(
        isup_cce_loss(y_pred2, y_true2, tile_rows=512, num_splits=2))
    ref2 = _isup_cce_loss_ref(y_pred2, y_true2)
    assert jnp.allclose(loss2, ref2, rtol=1e-4, atol=1e-2), (loss2, ref2)

    print("KERNEL_OK")
</pallas_src>

<mosaic_0001>
module attributes {stable_mosaic.version = 11 : i64} {
  func.func @_isup_cce_loss_kernel(%arg0: i32, %arg1: i32, %arg2: memref<8x128xf32, #tpu.memory_space<vmem>>, %arg3: memref<8x128xf32, #tpu.memory_space<vmem>>, %arg4: memref<8x128xf32, #tpu.memory_space<vmem>>, %arg5: memref<8x128xf32, #tpu.memory_space<vmem>>) attributes {dimension_semantics = [#tpu.dimension_semantics<parallel>, #tpu.dimension_semantics<arbitrary>], iteration_bounds = array<i64: 1, 1>, scalar_prefetch = 0 : i64, scratch_operands = 1 : i64, tpu.core_type = #tpu.core_type<tc>, window_params = [{transform_indices = @transform_0, window_bounds = array<i64: 8, 128>}, {transform_indices = @transform_1, window_bounds = array<i64: 8, 128>}, {transform_indices = @transform_2, window_bounds = array<i64: 8, 128>}]} {
    %c0_i32 = arith.constant 0 : i32
    %0 = arith.cmpi eq, %arg1, %c0_i32 : i32
    %1 = arith.extui %0 : i1 to i32
    %c0_i32_0 = arith.constant 0 : i32
    %2 = arith.cmpi ne, %1, %c0_i32_0 : i32
    scf.if %2 {
      %cst_12 = arith.constant 0.000000e+00 : f32
      %27 = vector.broadcast %cst_12 : f32 to vector<8x128xf32>
      %c0_13 = arith.constant 0 : index
      %c0_14 = arith.constant 0 : index
      %28 = vector.load %arg5[%c0_13, %c0_14] : memref<8x128xf32, #tpu.memory_space<vmem>>, vector<8x128xf32>
      tpu.vector_store %arg5[%c0_13, %c0_14], %27 {strides = array<i32>} : memref<8x128xf32, #tpu.memory_space<vmem>>, vector<8x128xf32>,
    } else {
    }
    %c0 = arith.constant 0 : index
    %c0_1 = arith.constant 0 : index
    %3 = vector.load %arg2[%c0, %c0_1] : memref<8x128xf32, #tpu.memory_space<vmem>>, vector<8x128xf32>
    %c0_2 = arith.constant 0 : index
    %c0_3 = arith.constant 0 : index
    %4 = vector.load %arg3[%c0_2, %c0_3] : memref<8x128xf32, #tpu.memory_space<vmem>>, vector<8x128xf32>
    %cst = arith.constant 1.000000e+00 : f32
    %5 = vector.broadcast %cst : f32 to vector<8x128xf32>
    %6 = arith.cmpf oeq, %4, %5 : vector<8x128xf32>
    %cst_4 = arith.constant 1.000000e+00 : f32
    %7 = vector.broadcast %cst_4 : f32 to vector<8x128xf32>
    %8 = arith.subf %7, %3 : vector<8x128xf32>
    %9 = arith.select %6, %3, %8 : vector<8x128xi1>, vector<8x128xf32>
    %cst_5 = arith.constant 1.000000e-07 : f32
    %cst_6 = arith.constant 9.990000e-01 : f32
    %10 = vector.broadcast %cst_5 : f32 to vector<8x128xf32>
    %11 = arith.maximumf %10, %9 : vector<8x128xf32>
    %12 = vector.broadcast %cst_6 : f32 to vector<8x128xf32>
    %13 = arith.minimumf %12, %11 : vector<8x128xf32>
    %c1_i32 = arith.constant 1 : i32
    %14 = arith.muli %arg0, %c1_i32 : i32
    %15 = arith.addi %14, %arg1 : i32
    %c1_i32_7 = arith.constant 1 : i32
    %16 = arith.addi %15, %c1_i32_7 : i32
    %c1024_i32 = arith.constant 1024 : i32
    %17 = arith.muli %16, %c1024_i32 : i32
    %c48_i32 = arith.constant 48 : i32
    %18 = arith.cmpi sgt, %17, %c48_i32 : i32
    %true = arith.constant true
    %19 = arith.xori %18, %true : i1
    %20 = arith.extui %19 : i1 to i32
    %c0_i32_8 = arith.constant 0 : i32
    %21 = arith.cmpi ne, %20, %c0_i32_8 : i32
    scf.if %21 {
      %c0_12 = arith.constant 0 : index
      %c0_13 = arith.constant 0 : index
      %27 = vector.load %arg5[%c0_12, %c0_13] : memref<8x128xf32, #tpu.memory_space<vmem>>, vector<8x128xf32>
      %28 = math.log %13 : vector<8x128xf32>
      %29 = vector.shape_cast %28 : vector<8x128xf32> to vector<1x8x128xf32>
      %cst_14 = arith.constant dense<0.000000e+00> : vector<8x128xf32>
      %30 = vector.multi_reduction <add>, %29, %cst_14 [0] : vector<1x8x128xf32> to vector<8x128xf32>
      %31 = arith.addf %27, %30 : vector<8x128xf32>
      %c0_15 = arith.constant 0 : index
      %c0_16 = arith.constant 0 : index
      %32 = vector.load %arg5[%c0_15, %c0_16] : memref<8x128xf32, #tpu.memory_space<vmem>>, vector<8x128xf32>
      tpu.vector_store %arg5[%c0_15, %c0_16], %31 {strides = array<i32>} : memref<8x128xf32, #tpu.memory_space<vmem>>, vector<8x128xf32>,
    } else {
    }
    %22 = arith.extui %18 : i1 to i32
    %c0_i32_9 = arith.constant 0 : i32
    %23 = arith.cmpi ne, %22, %c0_i32_9 : i32
    scf.if %23 {
      %27 = tpu.iota {dimensions = array<i32: 0>} : vector<8x128xi32>
      %28 = tpu.iota {dimensions = array<i32: 1>} : vector<8x128xi32>
      %c128_i32 = arith.constant 128 : i32
      %29 = vector.broadcast %c128_i32 : i32 to vector<8x128xi32>
      %30 = arith.muli %27, %29 : vector<8x128xi32>
      %31 = arith.addi %30, %28 : vector<8x128xi32>
      %c1024_i32_12 = arith.constant 1024 : i32
      %32 = arith.muli %15, %c1024_i32_12 : i32
      %c48_i32_13 = arith.constant 48 : i32
      %33 = arith.subi %c48_i32_13, %32 : i32
      %34 = vector.broadcast %33 : i32 to vector<8x128xi32>
      %35 = arith.cmpi slt, %31, %34 : vector<8x128xi32>
      %cst_14 = arith.constant 1.000000e+00 : f32
      %36 = vector.broadcast %cst_14 : f32 to vector<8x128xf32>
      %37 = arith.select %35, %13, %36 : vector<8x128xi1>, vector<8x128xf32>
      %c0_15 = arith.constant 0 : index
      %c0_16 = arith.constant 0 : index
      %38 = vector.load %arg5[%c0_15, %c0_16] : memref<8x128xf32, #tpu.memory_space<vmem>>, vector<8x128xf32>
      %39 = math.log %37 : vector<8x128xf32>
      %40 = vector.shape_cast %39 : vector<8x128xf32> to vector<1x8x128xf32>
      %cst_17 = arith.constant dense<0.000000e+00> : vector<8x128xf32>
      %41 = vector.multi_reduction <add>, %40, %cst_17 [0] : vector<1x8x128xf32> to vector<8x128xf32>
      %42 = arith.addf %38, %41 : vector<8x128xf32>
      %c0_18 = arith.constant 0 : index
      %c0_19 = arith.constant 0 : index
      %43 = vector.load %arg5[%c0_18, %c0_19] : memref<8x128xf32, #tpu.memory_space<vmem>>, vector<8x128xf32>
      tpu.vector_store %arg5[%c0_18, %c0_19], %42 {strides = array<i32>} : memref<8x128xf32, #tpu.memory_space<vmem>>, vector<8x128xf32>,
    } else {
    }
    %c0_i32_10 = arith.constant 0 : i32
    %24 = arith.cmpi eq, %arg1, %c0_i32_10 : i32
    %25 = arith.extui %24 : i1 to i32
    %c0_i32_11 = arith.constant 0 : i32
    %26 = arith.cmpi ne, %25, %c0_i32_11 : i32
    scf.if %26 {
      %c0_12 = arith.constant 0 : index
      %c0_13 = arith.constant 0 : index
      %27 = vector.load %arg5[%c0_12, %c0_13] : memref<8x128xf32, #tpu.memory_space<vmem>>, vector<8x128xf32>
      %c0_14 = arith.constant 0 : index
      %c0_15 = arith.constant 0 : index
      %28 = vector.load %arg4[%c0_14, %c0_15] : memref<8x128xf32, #tpu.memory_space<vmem>>, vector<8x128xf32>
      tpu.vector_store %arg4[%c0_14, %c0_15], %27 {strides = array<i32>} : memref<8x128xf32, #tpu.memory_space<vmem>>, vector<8x128xf32>,
    } else {
    }
    return
  }
  func.func @transform_0(%arg0: i32, %arg1: i32) -> (i32, i32) {
    %c1_i32 = arith.constant 1 : i32
    %0 = arith.muli %arg0, %c1_i32 : i32
    %1 = arith.addi %0, %arg1 : i32
    %c0_i32 = arith.constant 0 : i32
    %2 = arith.minsi %1, %c0_i32 : i32
    %c0_i32_0 = arith.constant 0 : i32
    %c0_i32_1 = arith.constant 0 : i32
    return %2, %c0_i32_0 : i32, i32
  }
  func.func @transform_1(%arg0: i32, %arg1: i32) -> (i32, i32) {
    %c1_i32 = arith.constant 1 : i32
    %0 = arith.muli %arg0, %c1_i32 : i32
    %1 = arith.addi %0, %arg1 : i32
    %c0_i32 = arith.constant 0 : i32
    %2 = arith.minsi %1, %c0_i32 : i32
    %c0_i32_0 = arith.constant 0 : i32
    %c0_i32_1 = arith.constant 0 : i32
    return %2, %c0_i32_0 : i32, i32
  }
  func.func @transform_2(%arg0: i32, %arg1: i32) -> (i32, i32) {
    %c0_i32 = arith.constant 0 : i32
    %c0_i32_0 = arith.constant 0 : i32
    return %arg0, %c0_i32 : i32, i32
  }
}

</mosaic_0001>

<bundles_post_ra>
// kernel: tpu_custom_call.1
= control target key start
LH: loop header
LB: loop body
LE: loop exit
PB: predicated region body
PF: predicated region fallthrough
CT: control target
= control target key end

     0   :  { %7 = vsyncpa [#allocation4], 0  ;;  %s257_s0 = inlined_call_operand.hbm [shape: f32[1,128], index: 0, kind: input, shape index: {}]   ;;  %s258_s1 = inlined_call_operand.hbm [shape: f32[1,128], index: 1, kind: input, shape index: {}]   ;;  %s259_s2 = inlined_call_operand.hbm [shape: f32[8,128], index: 2, kind: output, shape index: {}]  }
   0x1   :  { %8 = vsyncpa [#allocation7], 0 }
   0x2   :  { %9 = vsyncpa [#allocation5], 0 }
   0x3   :  { %19 = vsyncadd [#allocation4], 112  ;;  %s22_s11 = sshll.u32 %s257_s0, 4  ;;  %s228_s12 = smov [#allocation3]   ;;  %s23_s11 = int_to_ptr.hbm [resolvable:$true] %s22_s11 }
   0x4   :  { %s24_s13 = sshll.u32 %s228_s12, 4  ;;  %s229_s14 = smov 16   ;;  %s25_s13 = int_to_ptr.vmem [resolvable:$true] %s24_s13 }
   0x5   :  { %s230_s15 = smov 1  }
   0x6   :  { %30 = dma.hbm_to_vmem [thread:$0]  %s23_s11, 16, %s25_s13, [#allocation4], %s229_s14, %s229_s14, %s230_s15  }
   0x7   :  { %40 = vsyncadd [#allocation7], 112  ;;  %s43_s18 = sshll.u32 %s258_s1, 4  ;;  %s231_s19 = smov [#allocation6]   ;;  %s44_s18 = int_to_ptr.hbm [resolvable:$true] %s43_s18 }
   0x8   :  { %s45_s20 = sshll.u32 %s231_s19, 4  ;;  %s46_s20 = int_to_ptr.vmem [resolvable:$true] %s45_s20 }
   0x9   :  { %51 = dma.hbm_to_vmem [thread:$0]  %s44_s18, 16, %s46_s20, [#allocation7], %s229_s14, %s229_s14, %s230_s15  }
   0xa   :  { %222 = dma.done.wait [#allocation4], 128  }
   0xb   :  { %223 = vsyncadd [#allocation4], 4294967168 }
   0xc   :  { %224 = dma.done.wait [#allocation7], 128  }
   0xd   :  { %225 = vsyncadd [#allocation7], 4294967168  ;;  %v99_v0 = vlaneseq  ;;  %v75_v4 = vld [vmem:[#allocation3] sm:$0xff]  ;;  %v76_v5 = vld [vmem:[#allocation6] sm:$0xff]  ;;  %s232_s0 = smov [#allocation8]   ;;  %s128_s23 = sshll.u32 %s259_s2, 4  ;;  %s129_s23 = int_to_ptr.hbm [resolvable:$true] %s128_s23 }
   0xe   :  { %vm77_vm0 = vcmp.eq.f32.partialorder %v76_v5, 1.0  ;;  %v78_v6 = vsub.f32 1.0, %v75_v4  ;;  %s126_s1 = sshll.u32 %s232_s0, 4  ;;  %s127_s1 = int_to_ptr.vmem [resolvable:$true] %s126_s1 }
   0xf   :  { %v100_v1 = vshrl.u32 %v99_v0, 7  ;;  %v102_v2 = vand.u32 127, %v99_v0 }
  0x10   :  { %v79_v8 = vsel %vm77_vm0, %v75_v4, %v78_v6 }
  0x11   :  { %v103_v3 = vmul.u32 128, %v100_v1  ;;  %v80_v9 = vmax.f32 %v79_v8, 1e-07 }
  0x13   :  { %v104_v7 = vadd.s32 %v103_v3, %v102_v2  ;;  %v81_v10 = vmin.f32 %v80_v9, 0.999 }
  0x15   :  { %vm108_vm1 = vcmp.lt.s32.totalorder %v104_v7, 48 }
  0x16   :  { %v109_v11 = vsel %vm108_vm1, %v81_v10, 1.0 }
  0x17   :  { %148 = vlog2.f32 %v109_v11 }
  0x1d   :  { %v149_v12 = vpop.eup %148 }
  0x1e   :  { %v112_v13 = vmul.f32 0.6931472, %v149_v12 }
  0x20   :  { %120 = vst [vmem:[#allocation8] sm:$0xff] %v112_v13 }
  0x21   :  { %131 = dma.vmem_to_hbm [thread:$0]  %s127_s1, 128, %s129_s23, [#allocation5]  }
  0x22   :  { %226 = dma.done.wait [#allocation5], 128  }
  0x23   :  { %227 = vsyncadd [#allocation5], 4294967168 }
  0x24   :  { %136 = vsyncpa [#allocation4], 1 }
  0x25   :  { %137 = vsyncpa [#allocation7], 1 }
  0x26   :  { %138 = vsyncpa [#allocation5], 1 }

</bundles_post_ra>
